<compile_context>
chip_gen: v6e
topology: v6e:2x2x1
jax: 0.10.0
libtpu: 0.0.40
codegen_flags: <defaults>
</compile_context>

<pallas_src>
import math

import jax
import jax.numpy as jnp
from jax.experimental import pallas as pl
from jax.experimental.pallas import tpu as pltpu

LN_EPS = 1e-5                       # torch.nn.LayerNorm default eps
_STREAM_VMEM_CAP = 8 * 1024 * 1024  # cap on double-buffered x+out tiles


# Mirrors `self.activation = getattr(F, activation)` -- resolved at trace time.
def _get_activation(name: str):
    if name == "relu":
        return lambda h: jnp.maximum(h, 0.0)
    if name == "gelu":
        # torch.nn.functional.gelu default is the exact erf form.
        return lambda h: jax.nn.gelu(h, approximate=False)
    if name == "silu":
        return jax.nn.silu
    if name == "tanh":
        return jnp.tanh
    raise ValueError(f"unsupported activation: {name}")


# --------------------------------------------------------------------------
# tiling helpers
# --------------------------------------------------------------------------
def _pick_block_rows(B: int, D: int, itemsize: int, requested=None) -> int:
    """Largest aligned divisor of B under the VMEM cap, keeping grid >= 2."""
    align = 16 if itemsize < 4 else 8            # bf16 needs sublane pairs
    assert B % align == 0, f"batch {B} must be a multiple of {align}"
    if requested is not None:
        assert requested % align == 0 and B % requested == 0
        return requested
    # Streamed VMEM per step ~ 2 (x+out) * 2 (double buffer) * rows * D * item.
    cap_rows = max(align, (_STREAM_VMEM_CAP // (4 * D * itemsize)) // align * align)
    target = min(B, 2048, cap_rows)
    if B >= 2 * align:
        target = min(target, B // 2)             # grid >= 2 -> both v7x TCs busy
    block = max(align, (target // align) * align)
    while B % block:                             # largest aligned divisor
        block -= align
    return block


def _vmem_limit_bytes(block_rows: int, D: int, x_itemsize: int,
                      resident_bytes: int) -> int:
    streamed = 2 * 2 * block_rows * D * x_itemsize   # x-in + out, double-buffered
    est = streamed + 2 * resident_bytes + (2 << 20)
    # Explicit scoped limit: above v5e's 16 MiB default, well under v7x 64 MiB.
    return int(min(max(est, 16 << 20), 48 << 20))


# --------------------------------------------------------------------------
# single ResidualBlock
# --------------------------------------------------------------------------
def _make_kernel(activation: str, layer_norm: bool):
    act_fn = _get_activation(activation)

    def residual_block_kernel(x_ref, gamma_ref, beta_ref, w_ref, b_ref, out_ref):
        x = x_ref[...].astype(jnp.float32)                       # [TB, D]
        if layer_norm:
            # var = E[x^2] - mean^2: both reductions overlap in the XLU.
            mean = jnp.mean(x, axis=-1, keepdims=True)
            mean_sq = jnp.mean(x * x, axis=-1, keepdims=True)
            var = jnp.maximum(mean_sq - mean * mean, 0.0)
            inv = jax.lax.rsqrt(var + LN_EPS)                    # EUP slot
            h = (x - mean) * inv * gamma_ref[...] + beta_ref[...]
        else:
            h = x                                                # nn.Identity
        h = act_fn(h)
        # MXU matmul: explicit bf16 operands, f32 accumulation.
        y = jnp.dot(h.astype(jnp.bfloat16), w_ref[...],
                    preferred_element_type=jnp.float32)
        y = y + b_ref[...]
        # Re-read x near the residual use -> shorter f32 live range per tile.
        out_ref[...] = (x_ref[...].astype(jnp.float32) + y).astype(out_ref.dtype)

    return residual_block_kernel


def residual_block(x, gamma, beta, w, b, *, activation="relu",
                   layer_norm=True, block_rows=None):
    """y = x + Linear(activation(LayerNorm(x))); x:[B,D], w:[D_in,D_out], b:[D_out]."""
    B, D_in = x.shape
    D_in_w, D_out = w.shape
    assert D_in_w == D_in
    # Residual add in the PyTorch forward requires dim_out == dim_in.
    assert D_out == D_in, "ResidualBlock residual add needs dim_out == dim_in"

    itemsize = jnp.dtype(x.dtype).itemsize
    tb = _pick_block_rows(B, D_in, itemsize, block_rows)
    grid = (B // tb,)

    gamma2 = gamma.astype(jnp.float32).reshape(1, D_in)
    beta2 = beta.astype(jnp.float32).reshape(1, D_in)
    bias2 = b.astype(jnp.float32).reshape(1, D_out)
    w_bf16 = w.astype(jnp.bfloat16)              # halve resident weight bytes

    resident = w_bf16.size * 2 + (gamma2.size + beta2.size + bias2.size) * 4
    vmem_limit = _vmem_limit_bytes(tb, D_in, itemsize, resident)

    kernel = _make_kernel(activation, layer_norm)
    return pl.pallas_call(
        kernel,
        out_shape=jax.ShapeDtypeStruct((B, D_out), x.dtype),
        grid=grid,
        in_specs=[
            pl.BlockSpec((tb, D_in), lambda i: (i, 0)),       # x tile (streamed)
            pl.BlockSpec((1, D_in), lambda i: (0, 0)),        # LN gamma (resident)
            pl.BlockSpec((1, D_in), lambda i: (0, 0)),        # LN beta  (resident)
            pl.BlockSpec((D_in, D_out), lambda i: (0, 0)),    # W        (resident)
            pl.BlockSpec((1, D_out), lambda i: (0, 0)),       # bias     (resident)
        ],
        out_specs=pl.BlockSpec((tb, D_out), lambda i: (i, 0)),
        compiler_params=pltpu.CompilerParams(
            dimension_semantics=("parallel",),                # v7x: both TCs
            vmem_limit_bytes=vmem_limit),
    )(x, gamma2, beta2, w_bf16, bias2)


# --------------------------------------------------------------------------
# fused stack of N ResidualBlocks (activation tile stays resident in VMEM)
# --------------------------------------------------------------------------
def _make_stack_kernel(activation: str, layer_norm: bool, num_layers: int):
    act_fn = _get_activation(activation)

    def stack_kernel(x_ref, gammas_ref, betas_ref, ws_ref, bs_ref, out_ref):
        x = x_ref[...].astype(jnp.float32)                    # [TB, D], stays in VMEM
        for l in range(num_layers):                           # static unroll
            if layer_norm:
                mean = jnp.mean(x, axis=-1, keepdims=True)
                mean_sq = jnp.mean(x * x, axis=-1, keepdims=True)
                var = jnp.maximum(mean_sq - mean * mean, 0.0)
                inv = jax.lax.rsqrt(var + LN_EPS)
                h = (x - mean) * inv * gammas_ref[l] + betas_ref[l]
            else:
                h = x
            h = act_fn(h)
            y = jnp.dot(h.astype(jnp.bfloat16), ws_ref[l],
                        preferred_element_type=jnp.float32)
            x = x + y + bs_ref[l]
        out_ref[...] = x.astype(out_ref.dtype)

    return stack_kernel


def residual_block_stack(x, gammas, betas, ws, bs, *, activation="relu",
                         layer_norm=True, block_rows=None):
    """Applies L stacked ResidualBlocks in one pallas_call.

    x:[B,D], gammas/betas/bs:[L,D], ws:[L,D,D]. No intermediate HBM traffic.
    """
    B, D = x.shape
    L = ws.shape[0]
    assert ws.shape == (L, D, D)
    assert gammas.shape == (L, D) and betas.shape == (L, D) and bs.shape == (L, D)

    itemsize = jnp.dtype(x.dtype).itemsize
    tb = _pick_block_rows(B, D, itemsize, block_rows)
    grid = (B // tb,)

    gammas3 = gammas.astype(jnp.float32).reshape(L, 1, D)
    betas3 = betas.astype(jnp.float32).reshape(L, 1, D)
    bs3 = bs.astype(jnp.float32).reshape(L, 1, D)
    ws_bf16 = ws.astype(jnp.bfloat16)

    resident = ws_bf16.size * 2 + (gammas3.size + betas3.size + bs3.size) * 4
    vmem_limit = _vmem_limit_bytes(tb, D, itemsize, resident)

    kernel = _make_stack_kernel(activation, layer_norm, L)
    return pl.pallas_call(
        kernel,
        out_shape=jax.ShapeDtypeStruct((B, D), x.dtype),
        grid=grid,
        in_specs=[
            pl.BlockSpec((tb, D), lambda i: (i, 0)),          # x tile (streamed)
            pl.BlockSpec((L, 1, D), lambda i: (0, 0, 0)),     # gammas (resident)
            pl.BlockSpec((L, 1, D), lambda i: (0, 0, 0)),     # betas  (resident)
            pl.BlockSpec((L, D, D), lambda i: (0, 0, 0)),     # Ws     (resident)
            pl.BlockSpec((L, 1, D), lambda i: (0, 0, 0)),     # biases (resident)
        ],
        out_specs=pl.BlockSpec((tb, D), lambda i: (i, 0)),
        compiler_params=pltpu.CompilerParams(
            dimension_semantics=("parallel",),
            vmem_limit_bytes=vmem_limit),
    )(x, gammas3, betas3, ws_bf16, bs3)


# ---------------- pure-JAX reference (mirrors the PyTorch forward) ----------------
def reference(x, gamma, beta, w, b, activation="relu", layer_norm=True):
    x = x.astype(jnp.float32)
    if layer_norm:
        mean = jnp.mean(x, axis=-1, keepdims=True)
        var = jnp.mean((x - mean) ** 2, axis=-1, keepdims=True)
        h = (x - mean) / jnp.sqrt(var + LN_EPS) * gamma + beta
    else:
        h = x
    h = _get_activation(activation)(h)
    return x + h @ w + b


if __name__ == "__main__":
    key = jax.random.PRNGKey(0)
    kx, kw, kb, kg, kbe, ks = jax.random.split(key, 6)

    # Small shapes consistent with the module: flat [batch, dim] vectors,
    # dim_in == dim_out (residual), 128-wide features for lane-dense stores.
    B, D = 256, 128
    x = jax.random.normal(kx, (B, D), jnp.float32)
    # LayerNorm affine (torch default gamma=1, beta=0; perturb to exercise it).
    gamma = 1.0 + 0.1 * jax.random.normal(kg, (D,), jnp.float32)
    beta = 0.1 * jax.random.normal(kbe, (D,), jnp.float32)
    # nn.Linear default init: U(-1/sqrt(fan_in), 1/sqrt(fan_in)); stored [in, out].
    bound = 1.0 / math.sqrt(D)
    w = jax.random.uniform(kw, (D, D), jnp.float32, -bound, bound)
    b = jax.random.uniform(kb, (D,), jnp.float32, -bound, bound)

    # --- single block, f32 streaming, relu ---
    out = jax.block_until_ready(
        residual_block(x, gamma, beta, w, b, activation="relu", layer_norm=True))
    ref = reference(x, gamma, beta, w, b, activation="relu")
    assert out.shape == (B, D) and out.dtype == x.dtype
    assert jnp.allclose(out, ref, atol=2e-2, rtol=2e-2), (
        float(jnp.max(jnp.abs(out - ref))))

    # --- single block, bf16 streaming (halved HBM bytes), silu ---
    x_bf16 = x.astype(jnp.bfloat16)
    out_bf = jax.block_until_ready(
        residual_block(x_bf16, gamma, beta, w, b, activation="silu"))
    ref_bf = reference(x_bf16.astype(jnp.float32), gamma, beta, w, b,
                       activation="silu")
    assert out_bf.dtype == jnp.bfloat16
    assert jnp.allclose(out_bf.astype(jnp.float32), ref_bf, atol=5e-2, rtol=5e-2), (
        float(jnp.max(jnp.abs(out_bf.astype(jnp.float32) - ref_bf))))

    # --- fused stack of 3 blocks: activation tile never leaves VMEM ---
    L = 3
    kws = jax.random.split(ks, 4)
    gammas = 1.0 + 0.1 * jax.random.normal(kws[0], (L, D), jnp.float32)
    betas = 0.1 * jax.random.normal(kws[1], (L, D), jnp.float32)
    ws = jax.random.uniform(kws[2], (L, D, D), jnp.float32, -bound, bound)
    bs = jax.random.uniform(kws[3], (L, D), jnp.float32, -bound, bound)
    out_s = jax.block_until_ready(
        residual_block_stack(x, gammas, betas, ws, bs, activation="relu"))
    ref_s = x
    for l in range(L):
        ref_s = reference(ref_s, gammas[l], betas[l], ws[l], bs[l],
                          activation="relu")
    assert jnp.allclose(out_s, ref_s, atol=5e-2, rtol=5e-2), (
        float(jnp.max(jnp.abs(out_s - ref_s))))

    print("KERNEL_OK")
</pallas_src>

<mosaic_0001>
module attributes {stable_mosaic.version = 11 : i64} {
  func.func @residual_block_kernel(%arg0: i32, %arg1: memref<128x128xf32, #tpu.memory_space<vmem>>, %arg2: memref<1x128xf32, #tpu.memory_space<vmem>>, %arg3: memref<1x128xf32, #tpu.memory_space<vmem>>, %arg4: memref<128x128xbf16, #tpu.memory_space<vmem>>, %arg5: memref<1x128xf32, #tpu.memory_space<vmem>>, %arg6: memref<128x128xf32, #tpu.memory_space<vmem>>) attributes {dimension_semantics = [#tpu.dimension_semantics<parallel>], iteration_bounds = array<i64: 2>, scalar_prefetch = 0 : i64, scratch_operands = 0 : i64, tpu.core_type = #tpu.core_type<tc>, window_params = [{transform_indices = @transform_0, window_bounds = array<i64: 128, 128>}, {pipeline_mode = #tpu.pipeline_mode<synchronous>, transform_indices = @transform_1, window_bounds = array<i64: 1, 128>}, {pipeline_mode = #tpu.pipeline_mode<synchronous>, transform_indices = @transform_2, window_bounds = array<i64: 1, 128>}, {pipeline_mode = #tpu.pipeline_mode<synchronous>, transform_indices = @transform_3, window_bounds = array<i64: 128, 128>}, {pipeline_mode = #tpu.pipeline_mode<synchronous>, transform_indices = @transform_4, window_bounds = array<i64: 1, 128>}, {transform_indices = @transform_5, window_bounds = array<i64: 128, 128>}]} {
    %c0 = arith.constant 0 : index
    %c0_0 = arith.constant 0 : index
    %0 = vector.load %arg1[%c0, %c0_0] : memref<128x128xf32, #tpu.memory_space<vmem>>, vector<128x128xf32>
    %cst = arith.constant dense<0.000000e+00> : vector<128xf32>
    %1 = vector.multi_reduction <add>, %0, %cst [1] : vector<128x128xf32> to vector<128xf32>
    %2 = vector.shape_cast %1 : vector<128xf32> to vector<128x1xf32>
    %cst_1 = arith.constant 1.280000e+02 : f32
    %3 = vector.broadcast %cst_1 : f32 to vector<128x1xf32>
    %4 = arith.divf %2, %3 : vector<128x1xf32>
    %5 = arith.mulf %0, %0 : vector<128x128xf32>
    %cst_2 = arith.constant dense<0.000000e+00> : vector<128xf32>
    %6 = vector.multi_reduction <add>, %5, %cst_2 [1] : vector<128x128xf32> to vector<128xf32>
    %7 = vector.shape_cast %6 : vector<128xf32> to vector<128x1xf32>
    %cst_3 = arith.constant 1.280000e+02 : f32
    %8 = vector.broadcast %cst_3 : f32 to vector<128x1xf32>
    %9 = arith.divf %7, %8 : vector<128x1xf32>
    %10 = arith.mulf %4, %4 : vector<128x1xf32>
    %11 = arith.subf %9, %10 : vector<128x1xf32>
    %cst_4 = arith.constant 0.000000e+00 : f32
    %12 = vector.broadcast %cst_4 : f32 to vector<128x1xf32>
    %13 = arith.maximumf %11, %12 : vector<128x1xf32>
    %cst_5 = arith.constant 9.99999974E-6 : f32
    %14 = vector.broadcast %cst_5 : f32 to vector<128x1xf32>
    %15 = arith.addf %13, %14 : vector<128x1xf32>
    %16 = math.rsqrt %15 : vector<128x1xf32>
    %17 = vector.broadcast %4 : vector<128x1xf32> to vector<128x128xf32>
    %18 = arith.subf %0, %17 : vector<128x128xf32>
    %19 = vector.broadcast %16 : vector<128x1xf32> to vector<128x128xf32>
    %20 = arith.mulf %18, %19 : vector<128x128xf32>
    %c0_6 = arith.constant 0 : index
    %c0_7 = arith.constant 0 : index
    %21 = vector.load %arg2[%c0_6, %c0_7] : memref<1x128xf32, #tpu.memory_space<vmem>>, vector<1x128xf32>
    %22 = vector.broadcast %21 : vector<1x128xf32> to vector<128x128xf32>
    %23 = arith.mulf %20, %22 : vector<128x128xf32>
    %c0_8 = arith.constant 0 : index
    %c0_9 = arith.constant 0 : index
    %24 = vector.load %arg3[%c0_8, %c0_9] : memref<1x128xf32, #tpu.memory_space<vmem>>, vector<1x128xf32>
    %25 = vector.broadcast %24 : vector<1x128xf32> to vector<128x128xf32>
    %26 = arith.addf %23, %25 : vector<128x128xf32>
    %cst_10 = arith.constant 0.000000e+00 : f32
    %27 = vector.broadcast %cst_10 : f32 to vector<128x128xf32>
    %28 = arith.maximumf %26, %27 : vector<128x128xf32>
    %29 = arith.truncf %28 : vector<128x128xf32> to vector<128x128xbf16>
    %c0_11 = arith.constant 0 : index
    %c0_12 = arith.constant 0 : index
    %30 = vector.load %arg4[%c0_11, %c0_12] : memref<128x128xbf16, #tpu.memory_space<vmem>>, vector<128x128xbf16>
    %cst_13 = arith.constant dense<0.000000e+00> : vector<128x128xf32>
    %31 = tpu.matmul %29, %30, %cst_13 {dimension_numbers = #tpu.dot_dimension_numbers<[1], [0], [0], [1], [0, 0, 1, 1], [], []>} : vector<128x128xbf16>, vector<128x128xbf16>, vector<128x128xf32> -> vector<128x128xf32>
    %c0_14 = arith.constant 0 : index
    %c0_15 = arith.constant 0 : index
    %32 = vector.load %arg5[%c0_14, %c0_15] : memref<1x128xf32, #tpu.memory_space<vmem>>, vector<1x128xf32>
    %33 = vector.broadcast %32 : vector<1x128xf32> to vector<128x128xf32>
    %34 = arith.addf %31, %33 : vector<128x128xf32>
    %c0_16 = arith.constant 0 : index
    %c0_17 = arith.constant 0 : index
    %35 = vector.load %arg1[%c0_16, %c0_17] : memref<128x128xf32, #tpu.memory_space<vmem>>, vector<128x128xf32>
    %36 = arith.addf %35, %34 : vector<128x128xf32>
    %c0_18 = arith.constant 0 : index
    %c0_19 = arith.constant 0 : index
    %37 = vector.load %arg6[%c0_18, %c0_19] : memref<128x128xf32, #tpu.memory_space<vmem>>, vector<128x128xf32>
    tpu.vector_store %arg6[%c0_18, %c0_19], %36 {strides = array<i32>} : memref<128x128xf32, #tpu.memory_space<vmem>>, vector<128x128xf32>,
    return
  }
  func.func @transform_0(%arg0: i32) -> (i32, i32) {
    %c0_i32 = arith.constant 0 : i32
    %c0_i32_0 = arith.constant 0 : i32
    return %arg0, %c0_i32 : i32, i32
  }
  func.func @transform_1(%arg0: i32) -> (i32, i32) {
    %c0_i32 = arith.constant 0 : i32
    %c0_i32_0 = arith.constant 0 : i32
    %c0_i32_1 = arith.constant 0 : i32
    return %c0_i32, %c0_i32_0 : i32, i32
  }
  func.func @transform_2(%arg0: i32) -> (i32, i32) {
    %c0_i32 = arith.constant 0 : i32
    %c0_i32_0 = arith.constant 0 : i32
    %c0_i32_1 = arith.constant 0 : i32
    return %c0_i32, %c0_i32_0 : i32, i32
  }
  func.func @transform_3(%arg0: i32) -> (i32, i32) {
    %c0_i32 = arith.constant 0 : i32
    %c0_i32_0 = arith.constant 0 : i32
    %c0_i32_1 = arith.constant 0 : i32
    return %c0_i32, %c0_i32_0 : i32, i32
  }
  func.func @transform_4(%arg0: i32) -> (i32, i32) {
    %c0_i32 = arith.constant 0 : i32
    %c0_i32_0 = arith.constant 0 : i32
    %c0_i32_1 = arith.constant 0 : i32
    return %c0_i32, %c0_i32_0 : i32, i32
  }
  func.func @transform_5(%arg0: i32) -> (i32, i32) {
    %c0_i32 = arith.constant 0 : i32
    %c0_i32_0 = arith.constant 0 : i32
    return %arg0, %c0_i32 : i32, i32
  }
}

</mosaic_0001>

<bundles_post_ra>
// kernel: tpu_custom_call.1
= control target key start
LH: loop header
LB: loop body
LE: loop exit
PB: predicated region body
PF: predicated region fallthrough
CT: control target
= control target key end

     0   :  { %10 = vsyncpa [#allocation3], 0  ;;  %s1701_s0 = inlined_call_operand.hbm [shape: f32[256,128], index: 0, kind: input, shape index: {}]   ;;  %s1702_s1 = inlined_call_operand.vmem [shape: f32[1,128], index: 1, kind: input, shape index: {}]   ;;  %s1703_s2 = inlined_call_operand.vmem [shape: f32[1,128], index: 2, kind: input, shape index: {}]   ;;  %s1704_s3 = inlined_call_operand.hbm [shape: bf16[128,128], index: 3, kind: input, shape index: {}]   ;;  %s1705_s4 = inlined_call_operand.vmem [shape: f32[1,128], index: 4, kind: input, shape index: {}]   ;;  %s1706_s5 = inlined_call_operand.hbm [shape: f32[256,128], index: 5, kind: output, shape index: {}]  }
   0x1   :  { %12 = vsyncpa [#allocation3 + $0x1], 0 }
   0x2   :  { %13 = vsyncpa [#allocation6], 0 }
   0x3   :  { %14 = vsyncpa [#allocation4], 0 }
   0x4   :  { %16 = vsyncpa [#allocation4 + $0x1], 0  ;;  %s1228_s18 = smov 0   ;;  %s1230_s19 = smov 0  }
   0x5   :  { %s1232_s20 = smov 0   ;;  %s1234_s21 = smov 0  }
   0x6 LB: > { %s1249_s22 = sadd.s32 4294967295, %s1187_s21   ;;  %s869_s23 = sadd.s32 4294967294, %s1187_s21   ;;  %s1187_s21 = sphi %s1234_s21, %s1728_s21   ;;  %s1183_s20 = sphi %s1232_s20, %s1727_s20   ;;  %s1179_s19 = sphi %s1230_s19, %s1726_s19   ;;  %s1175_s18 = sphi %s1228_s18, %s1725_s18  }
   0x7   : > { %p42_p0 = scmp.ne.s32.totalorder %s1179_s19, %s1175_s18  ;;  %p1707_p1 = scmp.eq.s32.totalorder %s1249_s22, 0 }
   0x8   : > { %p156_p3 = scmp.eq.s32.totalorder %s869_s23, 1  ;;  %p870_p5 = scmp.ge.s32.totalorder %s1187_s21, 1 }
   0x9   : > { %p1258_p4 = por %p1707_p1, %p42_p0  ;;  %p163_p7 = scmp.lt.s32.totalorder %s1187_s21, 3 }
   0xa   : > { %p1263_p6 = por %p156_p3, %p42_p0  ;;  %s1189_s27 = smov [#allocation5]  }
   0xb   : > { %s1711_s24 = scalar_select %p1258_p4, 1, 0 }
   0xc   : > { %s1712_s25 = scalar_select %p1263_p6, 1, 0 }
   0xd   : > { %p1268_p8 = pnand %p870_p5, %p163_p7  ;;  %s181_s28 = sshll.u32 %s1189_s27, 4  ;;  %s182_s28 = int_to_ptr.vmem [resolvable:$true] %s181_s28 }
   0xe   : > { %s1282_s30 = sadd.s32 1, %s1187_s21   ;;  %s29_s6 = sadd.s32 1, %s1183_s20 }
   0xf   : > { %s1713_s26 = scalar_select %p1268_p8, 1, 0 }
  0x10   : > { %p970_p9 = pneg %p1268_p8  ;;  %s26_s7 = ssub.s32 %s1187_s21, %s1282_s30 }
  0x11   : > { %s1076_s8 = scalar_lea.vmem %s182_s28, 1024  ;;  %p1084_p5 = scmp.lt.s32.totalorder %s182_s28, %s182_s28 }
  0x12   : > { %p1277_p11 = pnand %p970_p9, %p1707_p1  ;;  %p1077_p13 = scmp.ne.s32.totalorder %s182_s28, %s1076_s8 }
  0x13   : > { %p1085_p7 = scmp.lt.s32.totalorder %s1076_s8, %s1076_s8 }
  0x14   : > { %p1067_p12 = pneg %p1277_p11 }
  0x15   : > { %p1086_p10 = por %p1085_p7, %p1084_p5 }
  0x16   : > { %p1079_p0 = pnand %p1077_p13, %p1067_p12 }
  0x18   : > { %p1080_p3 = pneg %p1079_p0 }
  0x1a   : > { %p1087_p2 = pnand %p1086_p10, %p1080_p3 }
  0x1c   : > { %1090 = shalt.err (!%p1087_p2)
}
  0x1d   : > { %s1190_s9 = smov 64   ;;  %s1191_s10 = smov 4  }
  0x1e   : > { %973 = dma.hbm_to_vmem [thread:$0]  (!%p1277_p11), %s1704_s3, 1024, %s182_s28, [#allocation6], %s1190_s9, %s1190_s9, %s1191_s10  }
  0x1f   : > { %p27_p9 = scmp.eq.s32.totalorder %s26_s7, 0  ;;  %p36_p12 = scmp.ne.s32.totalorder %s1183_s20, %s1179_s19 }
  0x20   : > { %p37_p10 = scmp.eq.s32.totalorder %s1187_s21, 0  ;;  %p983_p2 = scmp.lt.s32.totalorder %s1187_s21, 2 }
  0x21   : > { %s1299_s13 = scalar_select %p27_p9, %s1183_s20, %s29_s6  }
  0x22   : > { %p38_p13 = por %p37_p10, %p36_p12  ;;  %p1715_p0 = scmp.eq.s32.totalorder %s1249_s22, 1 }
  0x23   : > { %s198_s15 = sand.u32 1, %s1183_s20   ;;  %s896_s16 = sshll.u32 %s1187_s21, 11 }
  0x24   : > { %p1303_p3 = por %p1715_p0, %p36_p12  ;;  %s873_s17 = sshll.u32 %s198_s15, 7 }
  0x25   : > { %s1312_s29 = scalar_lea.hbm %s1701_s0, %s896_s16  ;;  %s202_s28 = scalar_lea.vmem [#allocation2], %s873_s17 }
  0x26   : > { %s1716_s14 = scalar_select %p1303_p3, 1, 0 }
  0x27   : > { %s209_s6 = sshll.u32 %s202_s28, 4  ;;  %p1314_p11 = pnand %p983_p2, %p38_p13  ;;  %s1318_s6 = int_to_ptr.vmem [resolvable:$true] %s209_s6 }
  0x28   : > { %s1320_s8 = scalar_lea.sflag [#allocation3], %s198_s15  ;;  %s1091_s9 = scalar_lea.hbm %s1312_s29, 2048 }
  0x29   : > { %p1092_p5 = scmp.ne.s32.totalorder %s1312_s29, %s1091_s9  ;;  %p1093_p7 = pneg %p1314_p11 }
  0x2a   : > { %s1096_s12 = scalar_lea.hbm %s1701_s0, 4096  ;;  %p1097_p10 = scmp.lt.s32.totalorder %s1312_s29, %s1701_s0 }
  0x2b   : > { %p1094_p9 = pnand %p1093_p7, %p1092_p5  ;;  %p1098_p2 = scmp.lt.s32.totalorder %s1096_s12, %s1091_s9 }
  0x2d   : > { %p1095_p12 = pneg %p1094_p9  ;;  %p1099_p13 = por %p1098_p2, %p1097_p10 }
  0x2f   : > { %p1100_p0 = pnand %p1099_p13, %p1095_p12 }
  0x31   : > { %1103 = shalt.err (!%p1100_p0)
}
  0x32   : > { %s1104_s15 = scalar_lea.vmem %s1318_s6, 2048  ;;  %s1192_s23 = smov [#allocation2]  }
  0x33   : > { %p1105_p1 = scmp.ne.s32.totalorder %s1318_s6, %s1104_s15  ;;  %s1109_s27 = sshll.u32 %s1192_s23, 4  ;;  %s1110_s27 = int_to_ptr.vmem [resolvable:$false] %s1109_s27 }
  0x34   : > { %s1111_s28 = scalar_lea.vmem %s1110_s27, 4096  ;;  %p1112_p9 = scmp.lt.s32.totalorder %s1318_s6, %s1110_s27 }
  0x35   : > { %p1107_p6 = pnand %p1105_p1, %p1093_p7  ;;  %p1113_p3 = scmp.lt.s32.totalorder %s1111_s28, %s1104_s15 }
  0x37   : > { %p1108_p5 = pneg %p1107_p6  ;;  %p1114_p4 = por %p1113_p3, %p1112_p9 }
  0x39   : > { %p1115_p8 = pnand %p1114_p4, %p1108_p5 }
  0x3b   : > { %1118 = shalt.err (!%p1115_p8)
}
  0x3c   : > { %s1193_s9 = smov 128   ;;  %s1194_s10 = smov 8  }
  0x3d   : > { %977 = dma.hbm_to_vmem [thread:$0]  (!%p1314_p11), %s1312_s29, 2048, %s1318_s6, %s1320_s8, %s1193_s9, %s1193_s9, %s1194_s10  }
  0x3e   : > { %p1718_p1 = scmp.ne.s32.totalorder %s1713_s26, 0 }
  0x3f   : > { %s1344_s11 = sand.u32 (!%p1718_p1), 1, %s1179_s19   ;;  %p1719_p4 = scmp.ne.s32.totalorder (!%p1718_p1), %s1711_s24, 0 }
  0x40   : > { %221 = sbr.rel (%p1718_p1) target bundleno = 522 (0x20a), region = 40  ;;  %s877_s12 = sshll.u32 (!%p1718_p1), %s1344_s11, 7 }
  0x41   : > { %s224_s16 = scalar_lea.sflag (!%p1718_p1), [#allocation3], %s1344_s11  ;;  %s1350_s17 = scalar_lea.vmem (!%p1718_p1), [#allocation2], %s877_s12 }
  0x45   : > { %1162 = dma.done.wait (%p1719_p4), %s224_s16, 2048  }
  0x46   : > { %1164 = vsyncadd (%p1719_p4), %s224_s16, 4294965248  ;;  %p1720_p6 = scmp.eq.s32.totalorder %s1249_s22, 0 }
  0x48   : > { %1166 = dma.done.wait (%p1720_p6), [#allocation6], 1024   ;;  %p1721_p8 = pmov %p1720_p6 }
  0x49   : > { %v1361_v0 = vld [vmem:[%s1350_s17 + $0x40] sm:$0xff]  ;;  %v1369_v2 = vld [vmem:[%s1350_s17 + $0x48] sm:$0xff]  ;;  %v1375_v4 = vld [vmem:[%s1350_s17 + $0x18] sm:$0xff]  ;;  %s1604_s15 = scalar_lea.vmem [#allocation7], %s877_s12  ;;  %s897_s23 = sshll.u32 %s1249_s22, 11 }
  0x4a   : > { %1168 = vsyncadd (%p1721_p8), [#allocation6], 4294966272  ;;  %v1364_v1 = vld [vmem:[%s1350_s17] sm:$0xff]  ;;  %293 = vadd.xlane.f32.xlu1 %v1361_v0  ;;  %v1372_v3 = vld [vmem:[%s1350_s17 + $0x8] sm:$0xff]  ;;  %v335_v10 = vmul.f32 %v1369_v2, %v1369_v2  ;;  %v334_v11 = vmul.f32 %v1361_v0, %v1361_v0  ;;  %v329_v12 = vmul.f32 %v1375_v4, %v1375_v4  ;;  %s786_s27 = sshll.u32 %s1604_s15, 4  ;;  %s1653_s10 = scalar_lea.hbm %s1706_s5, %s897_s23  ;;  %s1655_s27 = int_to_ptr.vmem [resolvable:$true] %s786_s27 }
  0x4b   : > { %277 = vadd.xlane.f32.xlu0 %v1364_v1  ;;  %v1380_v5 = vld [vmem:[%s1350_s17 + $0x10] sm:$0xff]  ;;  %v1383_v6 = vld [vmem:[%s1350_s17 + $0x58] sm:$0xff]  ;;  %v327_v8 = vmul.f32 %v1372_v3, %v1372_v3  ;;  %v326_v9 = vmul.f32 %v1364_v1, %v1364_v1  ;;  %v1409_v16 = vld [vmem:[%s1350_s17 + $0x28] sm:$0xff]  ;;  %s773_s22 = scalar_lea.sflag [#allocation4], %s1344_s11  ;;  %s1119_s12 = scalar_lea.vmem %s1655_s27, 2048 }
  0x4c   : > { %v1388_v7 = vld [vmem:[%s1350_s17 + $0x50] sm:$0xff]  ;;  %v328_v13 = vmul.f32 %v1380_v5, %v1380_v5  ;;  %v337_v14 = vmul.f32 %v1383_v6, %v1383_v6  ;;  %v1412_v17 = vld [vmem:[%s1350_s17 + $0x20] sm:$0xff]  ;;  %v1417_v18 = vld [vmem:[%s1350_s17 + $0x68] sm:$0xff]  ;;  %v331_v27 = vmul.f32 %v1409_v16, %v1409_v16  ;;  %p1120_p3 = scmp.ne.s32.totalorder %s1655_s27, %s1119_s12  ;;  %p1722_p11 = scmp.ne.s32.totalorder %s1716_s14, 0 }
  0x4d   : > { %v336_v15 = vmul.f32 %v1388_v7, %v1388_v7  ;;  %v1420_v19 = vld [vmem:[%s1350_s17 + $0x60] sm:$0xff]  ;;  %v1025_v20 = vld [vmem:[#allocation5 + $0x38] sm:$0xff]   ;;  %v1428_v22 = vld [vmem:[%s1350_s17 + $0x30] sm:$0xff]  ;;  %v330_v28 = vmul.f32 %v1412_v17, %v1412_v17  ;;  %v339_v30 = vmul.f32 %v1417_v18, %v1417_v18  ;;  %s1195_s16 = smov [#allocation7]  }
  0x4e   : > { %295 = vadd.xlane.f32.xlu1 %v1369_v2  ;;  %914 = vmatprep.subr.bf16.mxu0 %v1025_v20  ;;  %v1425_v21 = vld [vmem:[%s1350_s17 + $0x38] sm:$0xff]  ;;  %v1026_v23 = vld [vmem:[#allocation5 + $0x30] sm:$0xff]   ;;  %v1027_v26 = vld [vmem:[#allocation5 + $0x28] sm:$0xff]   ;;  %v338_v31 = vmul.f32 %v1420_v19, %v1420_v19  ;;  %v332_v34 = vmul.f32 %v1428_v22, %v1428_v22  ;;  %p1121_p7 = pnand %p1120_p3, %p1722_p11 }
  0x4f   : > { %279 = vadd.xlane.f32.xlu0 %v1372_v3  ;;  %946 = vmatprep.subr.bf16.mxu1 %v1025_v20  ;;  %v1433_v24 = vld [vmem:[%s1350_s17 + $0x78] sm:$0xff]  ;;  %v1436_v25 = vld [vmem:[%s1350_s17 + $0x70] sm:$0xff]  ;;  %v1028_v29 = vld [vmem:[#allocation5 + $0x20] sm:$0xff]   ;;  %v333_v33 = vmul.f32 %v1425_v21, %v1425_v21  ;;  %s1123_s17 = sshll.u32 %s1195_s16, 4  ;;  %s1124_s17 = int_to_ptr.vmem [resolvable:$false] %s1123_s17 }
  0x50   : > { %915 = vmatpush3.bf16.msra.mxu0 %v1025_v20  ;;  %954 = vmatpush3.bf16.msra.mxu1 %v1025_v20  ;;  %v1029_v32 = vld [vmem:[#allocation5 + $0x18] sm:$0xff]   ;;  %v1030_v35 = vld [vmem:[#allocation5 + $0x10] sm:$0xff]   ;;  %v341_v36 = vmul.f32 %v1433_v24, %v1433_v24  ;;  %v340_v37 = vmul.f32 %v1436_v25, %v1436_v25  ;;  %v1031_v38 = vld [vmem:[#allocation5 + $0x8] sm:$0xff]   ;;  %p1122_p12 = pneg %p1121_p7  ;;  %s1125_s24 = scalar_lea.vmem %s1124_s17, 4096 }
  0x51   : > { %916 = vmatprep.subr.bf16.mxu0 %v1026_v23  ;;  %947 = vmatprep.subr.bf16.mxu1 %v1026_v23  ;;  %v1032_v39 = vld [vmem:[#allocation5] sm:$0xff]   ;;  %p1126_p10 = scmp.lt.s32.totalorder %s1655_s27, %s1124_s17  ;;  %p1127_p2 = scmp.lt.s32.totalorder %s1125_s24, %s1119_s12 }
  0x52   : > { %283 = vadd.xlane.f32.xlu1 %v1375_v4 }
  0x53   : > { %281 = vadd.xlane.f32.xlu0 %v1380_v5  ;;  %p1128_p13 = por %p1127_p2, %p1126_p10 }
  0x54   : > { %917 = vmatpush3.bf16.msra.mxu0 %v1026_v23  ;;  %955 = vmatpush3.bf16.msra.mxu1 %v1026_v23 }
  0x55   : > { %918 = vmatprep.subr.bf16.mxu0 %v1027_v26  ;;  %948 = vmatprep.subr.bf16.mxu1 %v1027_v26  ;;  %p1129_p0 = pnand %p1128_p13, %p1122_p12 }
  0x56   : > { %299 = vadd.xlane.f32.xlu1 %v1383_v6 }
  0x57   : > { %297 = vadd.xlane.f32.xlu0 %v1388_v7 }
  0x58   : > { %919 = vmatpush3.bf16.msra.mxu0 %v1027_v26  ;;  %956 = vmatpush3.bf16.msra.mxu1 %v1027_v26 }
  0x59   : > { %920 = vmatprep.subr.bf16.mxu0 %v1028_v29  ;;  %949 = vmatprep.subr.bf16.mxu1 %v1028_v29 }
  0x5a   : > { %344 = vadd.xlane.f32.xlu1 %v327_v8 }
  0x5b   : > { %342 = vadd.xlane.f32.xlu0 %v326_v9 }
  0x5c   : > { %921 = vmatpush3.bf16.msra.mxu0 %v1028_v29  ;;  %957 = vmatpush3.bf16.msra.mxu1 %v1028_v29 }
  0x5d   : > { %922 = vmatprep.subr.bf16.mxu0 %v1029_v32  ;;  %950 = vmatprep.subr.bf16.mxu1 %v1029_v32 }
  0x5e   : > { %360 = vadd.xlane.f32.xlu1 %v335_v10 }
  0x5f   : > { %358 = vadd.xlane.f32.xlu0 %v334_v11 }
  0x60   : > { %923 = vmatpush3.bf16.msra.mxu0 %v1029_v32  ;;  %958 = vmatpush3.bf16.msra.mxu1 %v1029_v32 }
  0x61   : > { %924 = vmatprep.subr.bf16.mxu0 %v1030_v35  ;;  %951 = vmatprep.subr.bf16.mxu1 %v1030_v35 }
  0x62   : > { %348 = vadd.xlane.f32.xlu1 %v329_v12 }
  0x63   : > { %346 = vadd.xlane.f32.xlu0 %v328_v13 }
  0x64   : > { %925 = vmatpush3.bf16.msra.mxu0 %v1030_v35  ;;  %959 = vmatpush3.bf16.msra.mxu1 %v1030_v35 }
  0x65   : > { %926 = vmatprep.subr.bf16.mxu0 %v1031_v38  ;;  %952 = vmatprep.subr.bf16.mxu1 %v1031_v38 }
  0x66   : > { %364 = vadd.xlane.f32.xlu1 %v337_v14 }
  0x67   : > { %362 = vadd.xlane.f32.xlu0 %v336_v15 }
  0x68   : > { %927 = vmatpush3.bf16.msra.mxu0 %v1031_v38  ;;  %960 = vmatpush3.bf16.msra.mxu1 %v1031_v38 }
  0x69   : > { %928 = vmatprep.subr.bf16.mxu0 %v1032_v39  ;;  %953 = vmatprep.subr.bf16.mxu1 %v1032_v39 }
  0x6a   : > { %287 = vadd.xlane.f32.xlu1 %v1409_v16 }
  0x6b   : > { %285 = vadd.xlane.f32.xlu0 %v1412_v17 }
  0x6c   : > { %929 = vmatpush3.bf16.msra.mxu0 %v1032_v39  ;;  %961 = vmatpush3.bf16.msra.mxu1 %v1032_v39 }
  0x6e   : > { %303 = vadd.xlane.f32.xlu1 %v1417_v18 }
  0x6f   : > { %301 = vadd.xlane.f32.xlu0 %v1420_v19 }
  0x72   : > { %291 = vadd.xlane.f32.xlu1 %v1425_v21 }
  0x73   : > { %289 = vadd.xlane.f32.xlu0 %v1428_v22 }
  0x76   : > { %307 = vadd.xlane.f32.xlu1 %v1433_v24 }
  0x77   : > { %305 = vadd.xlane.f32.xlu0 %v1436_v25 }
  0x7a   : > { %352 = vadd.xlane.f32.xlu1 %v331_v27 }
  0x7b   : > { %350 = vadd.xlane.f32.xlu0 %v330_v28 }
  0x7e   : > { %368 = vadd.xlane.f32.xlu1 %v339_v30 }
  0x7f   : > { %366 = vadd.xlane.f32.xlu0 %v338_v31 }
  0x82   : > { %356 = vadd.xlane.f32.xlu1 %v333_v33 }
  0x83   : > { %354 = vadd.xlane.f32.xlu0 %v332_v34 }
  0x86   : > { %372 = vadd.xlane.f32.xlu1 %v341_v36 }
  0x87   : > { %370 = vadd.xlane.f32.xlu0 %v340_v37 }
  0xd3   : > { %v294_v40 = vpop.xlane.xlu1 %293 }
  0xd4   : > { %v278_v41 = vpop.xlane.xlu0 %277  ;;  %v1460_v50 = vmul.f32 0.0078125, %v294_v40 }
  0xd5   : > { %v1456_v48 = vmul.f32 0.0078125, %v278_v41 }
  0xd6   : > { %v398_v60 = vmul.f32 %v1460_v50, %v1460_v50 }
  0xd7   : > { %v296_v42 = vpop.xlane.xlu1 %295  ;;  %v390_v54 = vmul.f32 %v1456_v48, %v1456_v48 }
  0xd8   : > { %v280_v43 = vpop.xlane.xlu0 %279  ;;  %v1462_v51 = vmul.f32 0.0078125, %v296_v42 }
  0xd9   : > { %v1458_v49 = vmul.f32 0.0078125, %v280_v43 }
  0xda   : > { %v399_v61 = vmul.f32 %v1462_v51, %v1462_v51 }
  0xdb   : > { %v284_v44 = vpop.xlane.xlu1 %283  ;;  %v391_v55 = vmul.f32 %v1458_v49, %v1458_v49 }
  0xdc   : > { %v282_v45 = vpop.xlane.xlu0 %281  ;;  %v1472_v62 = vmul.f32 0.0078125, %v284_v44 }
  0xdd   : > { %v1474_v13 = vmul.f32 0.0078125, %v282_v45 }
  0xde   : > { %v393_v26 = vmul.f32 %v1472_v62, %v1472_v62 }
  0xdf   : > { %v300_v46 = vpop.xlane.xlu1 %299  ;;  %v392_v34 = vmul.f32 %v1474_v13, %v1474_v13 }
  0xe0   : > { %v298_v47 = vpop.xlane.xlu0 %297  ;;  %v1478_v27 = vmul.f32 0.0078125, %v300_v46 }
  0xe1   : > { %v1480_v28 = vmul.f32 0.0078125, %v298_v47 }
  0xe2   : > { %v401_v39 = vmul.f32 %v1478_v27, %v1478_v27 }
  0xe3   : > { %v345_v52 = vpop.xlane.xlu1 %344  ;;  %v400_v40 = vmul.f32 %v1480_v28, %v1480_v28 }
  0xe4   : > { %v343_v53 = vpop.xlane.xlu0 %342  ;;  %v375_v56 = vmul.f32 0.0078125, %v345_v52 }
  0xe5   : > { %v374_v57 = vmul.f32 0.0078125, %v343_v53 }
  0xe6   : > { %v407_v58 = vsub.f32 %v375_v56, %v391_v55 }
  0xe7   : > { %v406_v59 = vsub.f32 %v374_v57, %v390_v54  ;;  %v361_v63 = vpop.xlane.xlu1 %360 }
  0xe8   : > { %v359_v8 = vpop.xlane.xlu0 %358  ;;  %v423_v9 = vmax.f32 %v407_v58, 0.0  ;;  %v383_v11 = vmul.f32 0.0078125, %v361_v63 }
  0xe9   : > { %v422_v10 = vmax.f32 %v406_v59, 0.0  ;;  %v382_v12 = vmul.f32 0.0078125, %v359_v8 }
  0xea   : > { %v439_v14 = vadd.f32 1e-05, %v423_v9  ;;  %v415_v20 = vsub.f32 %v383_v11, %v399_v61  ;;  %v471_v11 = vsub.f32 %v1372_v3, %v1458_v49  ;;  %v1504_v49 = vld [vmem:[%s1703_s2] ss:$0 sm:$0xff] }
  0xeb   : > { %v438_v15 = vadd.f32 1e-05, %v422_v10  ;;  %v414_v23 = vsub.f32 %v382_v12, %v398_v60  ;;  %v349_v29 = vpop.xlane.xlu1 %348  ;;  %v470_v10 = vsub.f32 %v1364_v1, %v1456_v48  ;;  %v479_v48 = vsub.f32 %v1369_v2, %v1462_v51 }
  0xec   : > { %v347_v30 = vpop.xlane.xlu0 %346  ;;  %1033 = vrsqrt.f32 %v439_v14  ;;  %v431_v31 = vmax.f32 %v415_v20, 0.0  ;;  %v377_v33 = vmul.f32 0.0078125, %v349_v29  ;;  %v1495_v14 = vld [vmem:[%s1702_s1] ss:$0 sm:$0xff]  ;;  %v478_v29 = vsub.f32 %v1361_v0, %v1460_v50 }
  0xed   : > { %v430_v32 = vmax.f32 %v414_v23, 0.0  ;;  %1035 = vrsqrt.f32 %v438_v15  ;;  %v376_v35 = vmul.f32 0.0078125, %v347_v30 }
  0xee   : > { %v447_v36 = vadd.f32 1e-05, %v431_v31  ;;  %v409_v38 = vsub.f32 %v377_v33, %v393_v26  ;;  %v473_v31 = vsub.f32 %v1375_v4, %v1472_v62 }
  0xef   : > { %v446_v37 = vadd.f32 1e-05, %v430_v32  ;;  %v408_v41 = vsub.f32 %v376_v35, %v392_v34  ;;  %v365_v42 = vpop.xlane.xlu1 %364  ;;  %v472_v32 = vsub.f32 %v1380_v5, %v1474_v13 }
  0xf0   : > { %v363_v43 = vpop.xlane.xlu0 %362  ;;  %1037 = vrsqrt.f32 %v447_v36  ;;  %v425_v44 = vmax.f32 %v409_v38, 0.0  ;;  %v385_v45 = vmul.f32 0.0078125, %v365_v42  ;;  %v481_v42 = vsub.f32 %v1383_v6, %v1478_v27 }
  0xf1   : > { %v384_v46 = vmul.f32 0.0078125, %v363_v43  ;;  %1039 = vrsqrt.f32 %v446_v37  ;;  %v424_v47 = vmax.f32 %v408_v41, 0.0  ;;  %v480_v43 = vsub.f32 %v1388_v7, %v1480_v28 }
  0xf2   : > { %v441_v52 = vadd.f32 1e-05, %v425_v44  ;;  %v417_v53 = vsub.f32 %v385_v45, %v401_v39 }
  0xf3   : > { %v416_v54 = vsub.f32 %v384_v46, %v400_v40  ;;  %v440_v55 = vadd.f32 1e-05, %v424_v47  ;;  %v288_v56 = vpop.xlane.xlu1 %287 }
  0xf4   : > { %v286_v57 = vpop.xlane.xlu0 %285  ;;  %1041 = vrsqrt.f32 %v441_v52  ;;  %v433_v58 = vmax.f32 %v417_v53, 0.0  ;;  %v1512_v35 = vmul.f32 0.0078125, %v288_v56 }
  0xf5   : > { %v432_v59 = vmax.f32 %v416_v54, 0.0  ;;  %1043 = vrsqrt.f32 %v440_v55  ;;  %v1514_v51 = vmul.f32 0.0078125, %v286_v57 }
  0xf6   : > { %v449_v60 = vadd.f32 1e-05, %v433_v58  ;;  %v395_v56 = vmul.f32 %v1512_v35, %v1512_v35 }
  0xf7   : > { %v448_v61 = vadd.f32 1e-05, %v432_v59  ;;  %v304_v63 = vpop.xlane.xlu1 %303  ;;  %v394_v27 = vmul.f32 %v1514_v51, %v1514_v51 }
  0xf8   : > { %v302_v8 = vpop.xlane.xlu0 %301  ;;  %1045 = vrsqrt.f32 %v449_v60  ;;  %v1516_v36 = vmul.f32 0.0078125, %v304_v63 }
  0xf9   : > { %v1034_v9 = vpop.eup %1033  ;;  %1047 = vrsqrt.f32 %v448_v61  ;;  %v1518_v37 = vmul.f32 0.0078125, %v302_v8 }
  0xfa   : > { %v1036_v12 = vpop.eup %1035  ;;  %v487_v26 = vmul.f32 %v1034_v9, %v471_v11  ;;  %v403_v28 = vmul.f32 %v1516_v36, %v1516_v36 }
  0xfb   : > { %v292_v15 = vpop.xlane.xlu1 %291  ;;  %v486_v23 = vmul.f32 %v1036_v12, %v470_v10  ;;  %v402_v57 = vmul.f32 %v1518_v37, %v1518_v37 }
  0xfc   : > { %v290_v20 = vpop.xlane.xlu0 %289  ;;  %v510_v34 = vmul.f32 %v1495_v14, %v487_v26  ;;  %v1526_v44 = vmul.f32 0.0078125, %v292_v15 }
  0xfd   : > { %v1038_v30 = vpop.eup %1037  ;;  %v509_v33 = vmul.f32 %v1495_v14, %v486_v23  ;;  %v1528_v45 = vmul.f32 0.0078125, %v290_v20 }
  0xfe   : > { %v1040_v50 = vpop.eup %1039  ;;  %v533_v40 = vadd.f32 %v1504_v49, %v510_v34  ;;  %v495_v41 = vmul.f32 %v1038_v30, %v479_v48  ;;  %v397_v9 = vmul.f32 %v1526_v44, %v1526_v44 }
  0xff   : > { %v308_v38 = vpop.xlane.xlu1 %307  ;;  %v532_v62 = vadd.f32 %v1504_v49, %v509_v33  ;;  %v494_v13 = vmul.f32 %v1040_v50, %v478_v29  ;;  %v396_v20 = vmul.f32 %v1528_v45, %v1528_v45 }
 0x100   : > { %v306_v39 = vpop.xlane.xlu0 %305  ;;  %v549_v52 = vmax.f32 %v533_v40, 0.0  ;;  %v518_v54 = vmul.f32 %v1495_v14, %v495_v41  ;;  %v1548_v50 = vmul.f32 0.0078125, %v308_v38 }
 0x101   : > { %v1042_v46 = vpop.eup %1041  ;;  %v548_v47 = vmax.f32 %v532_v62, 0.0  ;;  %v517_v53 = vmul.f32 %v1495_v14, %v494_v13 }
 0x102   : > { %v1044_v55 = vpop.eup %1043  ;;  %v541_v63 = vadd.f32 %v1504_v49, %v518_v54  ;;  %v489_v12 = vmul.f32 %v1042_v46, %v473_v31 }
 0x103   : > { %v353_v58 = vpop.xlane.xlu1 %352  ;;  %v564_v60 = vpack.c.bf16 %v549_v52, %v548_v47  ;;  %v540_v61 = vadd.f32 %v1504_v49, %v517_v53  ;;  %v488_v8 = vmul.f32 %v1044_v55, %v472_v32 }
 0x104   : > { %v351_v59 = vpop.xlane.xlu0 %350  ;;  %v379_v10 = vmul.f32 0.0078125, %v353_v58  ;;  %v557_v26 = vmax.f32 %v541_v63, 0.0  ;;  %v512_v32 = vmul.f32 %v1495_v14, %v489_v12 }
 0x105   : > { %v378_v11 = vmul.f32 0.0078125, %v351_v59  ;;  %v1046_v15 = vpop.eup %1045  ;;  %930 = vmatprep.mubr.bf16.mxu0 %v564_v60  ;;  %v556_v23 = vmax.f32 %v540_v61, 0.0  ;;  %v511_v29 = vmul.f32 %v1495_v14, %v488_v8  ;;  %v1554_v60 = vmul.f32 0.0078125, %v306_v39 }
 0x106   : > { %v1048_v48 = vpop.eup %1047  ;;  %v411_v30 = vsub.f32 %v379_v10, %v395_v56  ;;  %v497_v34 = vmul.f32 %v1046_v15, %v481_v42  ;;  %v535_v54 = vadd.f32 %v1504_v49, %v512_v32 }
 0x107   : > { %v410_v33 = vsub.f32 %v378_v11, %v394_v27  ;;  %v369_v62 = vpop.xlane.xlu1 %368  ;;  %v568_v31 = vpack.c.bf16 %v557_v26, %v556_v23  ;;  %v534_v13 = vadd.f32 %v1504_v49, %v511_v29  ;;  %v496_v41 = vmul.f32 %v1048_v48, %v480_v43 }
 0x108   : > { %v367_v40 = vpop.xlane.xlu0 %366  ;;  %v427_v46 = vmax.f32 %v411_v30, 0.0  ;;  %v387_v52 = vmul.f32 0.0078125, %v369_v62  ;;  %v520_v42 = vmul.f32 %v1495_v14, %v497_v34  ;;  %v551_v63 = vmax.f32 %v535_v54, 0.0 }
 0x109   : > { %v426_v47 = vmax.f32 %v410_v33, 0.0  ;;  %v386_v53 = vmul.f32 0.0078125, %v367_v40  ;;  %938 = vmatprep.mubr.bf16.mxu1 %v568_v31  ;;  %v550_v55 = vmax.f32 %v534_v13, 0.0  ;;  %v519_v56 = vmul.f32 %v1495_v14, %v496_v41 }
 0x10a   : > { %v443_v38 = vadd.f32 1e-05, %v427_v46  ;;  %v419_v58 = vsub.f32 %v387_v52, %v403_v28  ;;  %v543_v10 = vadd.f32 %v1504_v49, %v520_v42  ;;  %v405_v30 = vmul.f32 %v1548_v50, %v1548_v50 }
 0x10b   : > { %v442_v27 = vadd.f32 1e-05, %v426_v47  ;;  %v418_v59 = vsub.f32 %v386_v53, %v402_v57  ;;  %v357_v61 = vpop.xlane.xlu1 %356  ;;  %v542_v8 = vadd.f32 %v1504_v49, %v519_v56  ;;  %v565_v26 = vpack.c.bf16 %v551_v63, %v550_v55 }
 0x10c   : > { %v355_v43 = vpop.xlane.xlu0 %354  ;;  %1049 = vrsqrt.f32 %v443_v38  ;;  %v435_v11 = vmax.f32 %v419_v58, 0.0  ;;  %v381_v15 = vmul.f32 0.0078125, %v357_v61  ;;  %v559_v39 = vmax.f32 %v543_v10, 0.0 }
 0x10d   : > { %v434_v12 = vmax.f32 %v418_v59, 0.0  ;;  %1051 = vrsqrt.f32 %v442_v27  ;;  %v380_v23 = vmul.f32 0.0078125, %v355_v43  ;;  %v558_v29 = vmax.f32 %v542_v8, 0.0  ;;  %931 = vmatmul.mubr.bf16.vlgmr.msra.gmra.mxu0 %v565_v26 }
 0x10e   : > { %v451_v48 = vadd.f32 1e-05, %v435_v11  ;;  %v413_v57 = vsub.f32 %v381_v15, %v397_v9  ;;  %v404_v33 = vmul.f32 %v1554_v60, %v1554_v60  ;;  %v475_v42 = vsub.f32 %v1409_v16, %v1512_v35 }
 0x10f   : > { %v450_v28 = vadd.f32 1e-05, %v434_v12  ;;  %v412_v32 = vsub.f32 %v380_v23, %v396_v20  ;;  %v373_v34 = vpop.xlane.xlu1 %372  ;;  %v569_v46 = vpack.c.bf16 %v559_v39, %v558_v29  ;;  %v474_v27 = vsub.f32 %v1412_v17, %v1514_v51 }
 0x110   : > { %v371_v62 = vpop.xlane.xlu0 %370  ;;  %1053 = vrsqrt.f32 %v451_v48  ;;  %v429_v40 = vmax.f32 %v413_v57, 0.0  ;;  %v389_v31 = vmul.f32 0.0078125, %v373_v34  ;;  %v483_v43 = vsub.f32 %v1417_v18, %v1516_v36 }
 0x111   : > { %v388_v13 = vmul.f32 0.0078125, %v371_v62  ;;  %1055 = vrsqrt.f32 %v450_v28  ;;  %v428_v41 = vmax.f32 %v412_v32, 0.0  ;;  %939 = vmatmul.mubr.bf16.vlgmr.msra.gmra.mxu1 %v569_v46  ;;  %v482_v10 = vsub.f32 %v1420_v19, %v1518_v37 }
 0x112   : > { %v445_v47 = vadd.f32 1e-05, %v429_v40  ;;  %v421_v9 = vsub.f32 %v389_v31, %v405_v30  ;;  %v477_v26 = vsub.f32 %v1425_v21, %v1526_v44  ;;  %v476_v28 = vsub.f32 %v1428_v22, %v1528_v45 }
 0x113   : > { %v420_v52 = vsub.f32 %v388_v13, %v404_v33  ;;  %v444_v53 = vadd.f32 1e-05, %v428_v41  ;;  %v485_v44 = vsub.f32 %v1433_v24, %v1548_v50  ;;  %v484_v45 = vsub.f32 %v1436_v25, %v1554_v60 }
 0x114   : > { %1057 = vrsqrt.f32 %v445_v47  ;;  %v437_v54 = vmax.f32 %v421_v9, 0.0 }
 0x115   : > { %v436_v55 = vmax.f32 %v420_v52, 0.0  ;;  %1059 = vrsqrt.f32 %v444_v53 }
 0x116   : > { %v453_v20 = vadd.f32 1e-05, %v437_v54 }
 0x117   : > { %v452_v56 = vadd.f32 1e-05, %v436_v55 }
 0x118   : > { %1061 = vrsqrt.f32 %v453_v20 }
 0x119   : > { %v1050_v38 = vpop.eup %1049  ;;  %1063 = vrsqrt.f32 %v452_v56 }
 0x11a   : > { %v1052_v58 = vpop.eup %1051  ;;  %v491_v59 = vmul.f32 %v1050_v38, %v475_v42 }
 0x11b   : > { %v490_v61 = vmul.f32 %v1052_v58, %v474_v27 }
 0x11c   : > { %v514_v63 = vmul.f32 %v1495_v14, %v491_v59 }
 0x11d   : > { %v1054_v8 = vpop.eup %1053  ;;  %v513_v35 = vmul.f32 %v1495_v14, %v490_v61 }
 0x11e   : > { %v1056_v11 = vpop.eup %1055  ;;  %v537_v12 = vadd.f32 %v1504_v49, %v514_v63  ;;  %v499_v15 = vmul.f32 %v1054_v8, %v483_v43  ;;  %v1597_v43 = vld [vmem:[%s1705_s4] ss:$0 sm:$0xff] }
 0x11f   : > { %v536_v51 = vadd.f32 %v1504_v49, %v513_v35  ;;  %v498_v23 = vmul.f32 %v1056_v11, %v482_v10 }
 0x120   : > { %v553_v29 = vmax.f32 %v537_v12, 0.0  ;;  %v522_v36 = vmul.f32 %v1495_v14, %v499_v15 }
 0x121   : > { %v1058_v48 = vpop.eup %1057  ;;  %v552_v37 = vmax.f32 %v536_v51, 0.0  ;;  %v521_v57 = vmul.f32 %v1495_v14, %v498_v23 }
 0x122   : > { %v1060_v39 = vpop.eup %1059  ;;  %v545_v30 = vadd.f32 %v1504_v49, %v522_v36  ;;  %v493_v33 = vmul.f32 %v1058_v48, %v477_v26 }
 0x123   : > { %v566_v32 = vpack.c.bf16 %v553_v29, %v552_v37  ;;  %v544_v34 = vadd.f32 %v1504_v49, %v521_v57  ;;  %v492_v62 = vmul.f32 %v1060_v39, %v476_v28 }
 0x124   : > { %v561_v40 = vmax.f32 %v545_v30, 0.0  ;;  %v516_v31 = vmul.f32 %v1495_v14, %v493_v33 }
 0x125   : > { %v1062_v13 = vpop.eup %1061  ;;  %934 = vmatprep.mubr.bf16.mxu0 %v566_v32  ;;  %v560_v41 = vmax.f32 %v544_v34, 0.0  ;;  %v515_v46 = vmul.f32 %v1495_v14, %v492_v62 }
 0x126   : > { %v1064_v47 = vpop.eup %1063  ;;  %v539_v9 = vadd.f32 %v1504_v49, %v516_v31  ;;  %v501_v52 = vmul.f32 %v1062_v13, %v485_v44 }
 0x127   : > { %v570_v53 = vpack.c.bf16 %v561_v40, %v560_v41  ;;  %v538_v54 = vadd.f32 %v1504_v49, %v515_v46  ;;  %v500_v55 = vmul.f32 %v1064_v47, %v484_v45 }
 0x128   : > { %v555_v50 = vmax.f32 %v539_v9, 0.0  ;;  %v524_v20 = vmul.f32 %v1495_v14, %v501_v52 }
 0x129   : > { %942 = vmatprep.mubr.bf16.mxu1 %v570_v53  ;;  %v554_v56 = vmax.f32 %v538_v54, 0.0  ;;  %v523_v42 = vmul.f32 %v1495_v14, %v500_v55 }
 0x12a   : > { %v547_v60 = vadd.f32 %v1504_v49, %v524_v20 }
 0x12b   : > { %v567_v38 = vpack.c.bf16 %v555_v50, %v554_v56  ;;  %v546_v27 = vadd.f32 %v1504_v49, %v523_v42 }
 0x12c   : > { %v563_v58 = vmax.f32 %v547_v60, 0.0 }
 0x12d   : > { %935 = vmatmul.mubr.bf16.gmra.mxu0 %v567_v38  ;;  %v562_v59 = vmax.f32 %v546_v27, 0.0 }
 0x12f   : > { %v571_v61 = vpack.c.bf16 %v563_v58, %v562_v59 }
 0x131   : > { %943 = vmatmul.mubr.bf16.gmra.mxu1 %v571_v61 }
 0x1cd   : > { %v932_v63 = vpop.f32.mrf.mxu0 }
 0x1ce   : > { %v686_v8 = vadd.f32 %v932_v63, %v1597_v43 }
 0x1cf   : > { %v677_v14 = vpop.f32.mrf.mxu0 }
 0x1d0   : > { %v742_v10 = vadd.f32 %v686_v8, %v1380_v5  ;;  %v678_v35 = vadd.f32 %v1597_v43, %v677_v14 }
 0x1d1   : > { %v933_v11 = vpop.f32.mrf.mxu0  ;;  %v940_v49 = vpop.f32.mrf.mxu1 }
 0x1d2   : > { %758 = vst [vmem:[%s1604_s15 + $0x10] sm:$0xff] %v742_v10  ;;  %v740_v12 = vadd.f32 %v678_v35, %v1364_v1  ;;  %v689_v15 = vadd.f32 %v933_v11, %v1597_v43  ;;  %v718_v51 = vadd.f32 %v940_v49, %v1597_v43 }
 0x1d3   : > { %v680_v5 = vpop.f32.mrf.mxu0  ;;  %v709_v23 = vpop.f32.mrf.mxu1 }
 0x1d4   : > { %756 = vst [vmem:[%s1604_s15] sm:$0xff] %v740_v12  ;;  %v743_v26 = vadd.f32 %v689_v15, %v1375_v4  ;;  %v750_v29 = vadd.f32 %v718_v51, %v1388_v7  ;;  %v681_v36 = vadd.f32 %v1597_v43, %v680_v5  ;;  %v710_v48 = vadd.f32 %v1597_v43, %v709_v23 }
 0x1d5   : > { %v941_v1 = vpop.f32.mrf.mxu1 }
 0x1d6   : > { %759 = vst [vmem:[%s1604_s15 + $0x18] sm:$0xff] %v743_v26  ;;  %766 = vst [vmem:[%s1604_s15 + $0x50] sm:$0xff] %v750_v29  ;;  %v741_v28 = vadd.f32 %v681_v36, %v1372_v3  ;;  %v748_v37 = vadd.f32 %v710_v48, %v1361_v0  ;;  %v721_v57 = vadd.f32 %v941_v1, %v1597_v43 }
 0x1d7   : > { %v712_v39 = vpop.f32.mrf.mxu1 }
 0x1d8   : > { %757 = vst [vmem:[%s1604_s15 + $0x8] sm:$0xff] %v741_v28  ;;  %764 = vst [vmem:[%s1604_s15 + $0x40] sm:$0xff] %v748_v37  ;;  %v751_v4 = vadd.f32 %v721_v57, %v1383_v6  ;;  %v713_v7 = vadd.f32 %v1597_v43, %v712_v39 }
 0x1da   : > { %767 = vst [vmem:[%s1604_s15 + $0x58] sm:$0xff] %v751_v4  ;;  %v749_v30 = vadd.f32 %v713_v7, %v1369_v2 }
 0x1dc   : > { %765 = vst [vmem:[%s1604_s15 + $0x48] sm:$0xff] %v749_v30 }
 0x1ed   : > { %v936_v33 = vpop.f32.mrf.mxu0 }
 0x1ee   : > { %v702_v3 = vadd.f32 %v936_v33, %v1597_v43 }
 0x1ef   : > { %v693_v32 = vpop.f32.mrf.mxu0 }
 0x1f0   : > { %v746_v0 = vadd.f32 %v702_v3, %v1428_v22  ;;  %v694_v34 = vadd.f32 %v1597_v43, %v693_v32 }
 0x1f1   : > { %v937_v62 = vpop.f32.mrf.mxu0  ;;  %v944_v44 = vpop.f32.mrf.mxu1 }
 0x1f2   : > { %762 = vst [vmem:[%s1604_s15 + $0x30] sm:$0xff] %v746_v0  ;;  %v744_v6 = vadd.f32 %v694_v34, %v1412_v17  ;;  %v705_v40 = vadd.f32 %v937_v62, %v1597_v43  ;;  %v734_v2 = vadd.f32 %v944_v44, %v1597_v43 }
 0x1f3   : > { %v696_v31 = vpop.f32.mrf.mxu0  ;;  %v725_v13 = vpop.f32.mrf.mxu1 }
 0x1f4   : > { %760 = vst [vmem:[%s1604_s15 + $0x20] sm:$0xff] %v744_v6  ;;  %v747_v22 = vadd.f32 %v705_v40, %v1425_v21  ;;  %v754_v45 = vadd.f32 %v734_v2, %v1436_v25  ;;  %v697_v41 = vadd.f32 %v1597_v43, %v696_v31  ;;  %v726_v46 = vadd.f32 %v1597_v43, %v725_v13 }
 0x1f5   : > { %v945_v17 = vpop.f32.mrf.mxu1 }
 0x1f6   : > { %763 = vst [vmem:[%s1604_s15 + $0x38] sm:$0xff] %v747_v22  ;;  %770 = vst [vmem:[%s1604_s15 + $0x70] sm:$0xff] %v754_v45  ;;  %v745_v47 = vadd.f32 %v697_v41, %v1409_v16  ;;  %v752_v9 = vadd.f32 %v726_v46, %v1420_v19  ;;  %v737_v52 = vadd.f32 %v945_v17, %v1597_v43 }
 0x1f7   : > { %v728_v21 = vpop.f32.mrf.mxu1 }
 0x1f8   : > { %761 = vst [vmem:[%s1604_s15 + $0x28] sm:$0xff] %v745_v47  ;;  %768 = vst [vmem:[%s1604_s15 + $0x60] sm:$0xff] %v752_v9  ;;  %v755_v25 = vadd.f32 %v737_v52, %v1433_v24  ;;  %v729_v53 = vadd.f32 %v1597_v43, %v728_v21 }
 0x1fa   : > { %771 = vst [vmem:[%s1604_s15 + $0x78] sm:$0xff] %v755_v25  ;;  %v753_v16 = vadd.f32 %v729_v53, %v1417_v18 }
 0x1fc   : > { %769 = vst [vmem:[%s1604_s15 + $0x68] sm:$0xff] %v753_v16 }
 0x1fd   : > { %1132 = shalt.err (!%p1129_p0)
}
 0x1fe   : > { %s1133_s26 = scalar_lea.hbm %s1653_s10, 2048  ;;  %s1137_s7 = scalar_lea.hbm %s1706_s5, 4096 }
 0x1ff   : > { %p1134_p5 = scmp.ne.s32.totalorder %s1653_s10, %s1133_s26  ;;  %p1138_p4 = scmp.lt.s32.totalorder %s1653_s10, %s1706_s5 }
 0x200   : > { %p1139_p6 = scmp.lt.s32.totalorder %s1137_s7, %s1133_s26 }
 0x201   : > { %p1135_p9 = pnand %p1134_p5, %p1722_p11 }
 0x202   : > { %p1140_p8 = por %p1139_p6, %p1138_p4 }
 0x203   : > { %p1136_p1 = pneg %p1135_p9 }
 0x205   : > { %p1141_p3 = pnand %p1140_p8, %p1136_p1 }
 0x207   : > { %1144 = shalt.err (!%p1141_p3)
}
 0x208   : > { %s1196_s23 = smov 128   ;;  %s1197_s28 = smov 8  }
 0x209   : > { %968 = dma.vmem_to_hbm [thread:$0]  (%p1722_p11), %s1655_s27, 2048, %s1653_s10, %s773_s22, %s1196_s23, %s1196_s23, %s1197_s28  }
 0x20a PF: > { %s801_s9 = sand.u32 1, %s1175_s18   ;;  %p1723_p7 = scmp.ne.s32.totalorder %s1712_s25, 0 }
 0x20b   : > { %p1724_p12 = scmp.ge.s32.totalorder %s1187_s21, 2  ;;  %s802_s12 = scalar_lea.sflag [#allocation4], %s801_s9 }
 0x20d   : > { %p979_p10 = pnand %p1724_p12, %p1723_p7 }
 0x20f   : > { %p980_p2 = pneg %p979_p10 }
 0x211   : > { %1170 = dma.done.wait (%p980_p2), %s802_s12, 2048  }
 0x212   : > { %1172 = vsyncadd (%p980_p2), %s802_s12, 4294965248  ;;  %p19_p13 = scmp.ge.s32.totalorder %s1282_s30, 4   ;;  %s1725_s18 = smov %s1179_s19 }
 0x213   : > { %s1726_s19 = smov %s1183_s20  ;;  %s1727_s20 = smov %s1299_s13 }
 0x214   : > { %s1728_s21 = smov %s1282_s30  ;;  %21 = sbr.rel (!%p19_p13) target bundleno = 6 (0x6), region = 89 }
 0x219   :  { %807 = vsyncpa [#allocation3], 1 }
 0x21a   :  { %809 = vsyncpa [#allocation3 + $0x1], 1 }
 0x21b   :  { %810 = vsyncpa [#allocation6], 1 }
 0x21c   :  { %811 = vsyncpa [#allocation4], 1 }
 0x21d   :  { %813 = vsyncpa [#allocation4 + $0x1], 1 }

</bundles_post_ra>
